<compile_context>
chip_gen: v5e
topology: v5e:2x2
jax: 0.10.0
libtpu: 0.0.40
codegen_flags: <defaults>
</compile_context>

<pallas_src>
import math

import jax
import jax.numpy as jnp
from jax.experimental import pallas as pl
from jax.experimental.pallas import tpu as pltpu


def _gelu_exact(x):
    # matches torch.nn.functional.gelu default (erf-based, not tanh approx)
    return 0.5 * x * (1.0 + jax.lax.erf(x * (1.0 / math.sqrt(2.0))))


def _round_up(x, m):
    return ((x + m - 1) // m) * m


def _lcm(a, b):
    return a * b // math.gcd(a, b)


# ------------------------------------------------------------------------- kernel
def decoder_kernel(x_ref, we_ref, w1_ref, b1_ref, w2_ref, b2_ref,
                   w3_ref, b3_ref, pe_ref, out_ref):
    cdt = x_ref.dtype  # bf16 MXU inputs; accumulation is f32

    # DataEmbedding: token (linear) embedding + precomputed positional encoding.
    h = jnp.dot(x_ref[...], we_ref[...], preferred_element_type=jnp.float32)
    h = h + pe_ref[...]

    # conv1 (k=1) + GELU : model_dim -> ff_dim
    h1 = jnp.dot(h.astype(cdt), w1_ref[...], preferred_element_type=jnp.float32)
    h1 = _gelu_exact(h1 + b1_ref[...])

    # conv2 (k=1) + GELU : ff_dim -> model_dim
    h2 = jnp.dot(h1.astype(cdt), w2_ref[...], preferred_element_type=jnp.float32)
    h2 = _gelu_exact(h2 + b2_ref[...])

    # conv3 / fc_mu (k=1) : model_dim -> feature_num
    mu = jnp.dot(h2.astype(cdt), w3_ref[...], preferred_element_type=jnp.float32)
    out_ref[...] = (mu + b3_ref[...]).astype(out_ref.dtype)


# ------------------------------------------------------------------------- params
def init_decoder_params(key, window_size, feature_num, model_dim, ff_dim, hidden_dim):
    """Deterministic synthetic parameters (shapes match the PyTorch module)."""
    ks = jax.random.split(key, 8)

    def kaiming_fan_in(k, fan_in, shape, a=0.01):
        gain = math.sqrt(2.0 / (1.0 + a * a))
        std = gain / math.sqrt(fan_in)
        return (std * jax.random.normal(k, shape)).astype(jnp.float32)

    def conv_bias(k, fan_in, shape):
        bound = 1.0 / math.sqrt(fan_in)
        return jax.random.uniform(k, shape, minval=-bound, maxval=bound,
                                  dtype=jnp.float32)

    # weights stored as [in_channels, out_channels] (transpose of conv weight [out, in, 1])
    params = dict(
        we=kaiming_fan_in(ks[0], hidden_dim, (hidden_dim, model_dim)),     # DataEmbedding
        w1=kaiming_fan_in(ks[1], model_dim, (model_dim, ff_dim)),          # conv1
        b1=conv_bias(ks[2], model_dim, (1, ff_dim)),
        w2=kaiming_fan_in(ks[3], ff_dim, (ff_dim, model_dim)),             # conv2
        b2=conv_bias(ks[4], ff_dim, (1, model_dim)),
        w3=kaiming_fan_in(ks[5], model_dim, (model_dim, feature_num)),     # conv3 (fc_mu)
        b3=conv_bias(ks[6], model_dim, (1, feature_num)),
    )
    return params


# ------------------------------------------------------------------- tiling policy
def _chip_config():
    """Generation-aware limits. Defaults are safe for v7x (64 MiB VMEM, 2 TCs)."""
    tm_max, vmem_bytes, force_split = 512, 32 * 1024 * 1024, False
    try:
        vmem_cap = pltpu.get_tpu_info().vmem_capacity_bytes
        if vmem_cap >= 96 * 1024 * 1024:
            # v5e / v6e: 128 MiB physical VMEM, single TensorCore -> fat tiles,
            # no forced grid split (splitting is pure per-step overhead on 1 TC).
            tm_max, vmem_bytes, force_split = 1024, 64 * 1024 * 1024, False
        else:
            # v7x: 64 MiB VMEM, 2 TensorCores -> keep the 32 MiB scoped limit and
            # split the row range so both cores get work ("parallel" grid axis).
            tm_max, vmem_bytes, force_split = 512, 32 * 1024 * 1024, True
    except Exception:
        pass
    return tm_max, vmem_bytes, force_split


def _choose_tm(M, window_size, tm_max, force_split):
    """Row tile. Prefer tm % window_size == 0 so one precomputed [tm, model_dim] PE
    tile is valid for every grid step (grid-invariant const block). tm is a multiple
    of 16 (bf16 sublane packing)."""
    base = _lcm(window_size, 16)
    if base <= tm_max:
        tm = (tm_max // base) * base
        tm = min(tm, _round_up(M, base))                   # never larger than needed
        if force_split and M > base:                       # give both v7x cores work
            tm = min(tm, _round_up(pl.cdiv(M, 2), base))
        return max(tm, base), True                         # (tm, PE tile invariant)
    # window_size too large for an invariant PE tile: fall back to streaming a
    # per-row PE block from HBM.
    tm = min(tm_max, _round_up(M, 16))
    if force_split and M > 16:
        tm = min(tm, _round_up(pl.cdiv(M, 2), 16))
    return max(tm, 16), False


# ------------------------------------------------------------------------ wrapper
def decoder_forward(z, params, *, compute_dtype=jnp.bfloat16):
    """z: [B, window_size, hidden_dim] -> mu: [B, window_size, feature_num] (f32)."""
    B, W, H = z.shape
    model_dim = params["we"].shape[1]
    ff_dim = params["w1"].shape[1]
    feature_num = params["w3"].shape[1]

    tm_max, vmem_bytes, force_split = _chip_config()

    M = B * W
    tm, pe_invariant = _choose_tm(M, W, tm_max, force_split)
    grid = pl.cdiv(M, tm)
    M_pad = grid * tm

    # Lane-dense internal channel dims (weights + intermediates). Zero padding is
    # exact: padded channels stay 0 through GELU and hit zero weight rows.
    MD = _round_up(model_dim, 128)
    FF = _round_up(ff_dim, 128)
    # Output width: pad to a 128 multiple only when feature_num is large; for tiny
    # feature_num masked stores beat a padded (inflated) writeback slab.
    F = _round_up(feature_num, 128) if feature_num >= 96 else feature_num

    # x stream: bf16, rows padded to the grid; H intentionally left unpadded (the
    # (tm, H) tile is contiguous in HBM; padding would inflate the input stream).
    x = z.reshape(M, H).astype(compute_dtype)
    if M_pad != M:
        x = jnp.pad(x, ((0, M_pad - M), (0, 0)))

    def pad2(a, r, c):
        return jnp.pad(a, ((0, r - a.shape[0]), (0, c - a.shape[1])))

    we = pad2(params["we"], H, MD).astype(compute_dtype)
    w1 = pad2(params["w1"], MD, FF).astype(compute_dtype)
    b1 = pad2(params["b1"], 1, FF).astype(jnp.float32)
    w2 = pad2(params["w2"], FF, MD).astype(compute_dtype)
    b2 = pad2(params["b2"], 1, MD).astype(jnp.float32)
    w3 = pad2(params["w3"], MD, F).astype(compute_dtype)
    b3 = pad2(params["b3"], 1, F).astype(jnp.float32)

    # Sinusoidal positional encoding, precomputed in the wrapper (f32, added to the
    # f32 accumulator in-kernel — no in-kernel sin/cos/iota on the EUP/VALU).
    ch = jnp.arange(model_dim, dtype=jnp.float32)
    inv_freq = jnp.exp(-(jnp.floor(ch / 2.0) * 2.0) * (math.log(10000.0) / model_dim))
    pos = jnp.arange(W, dtype=jnp.float32)[:, None]
    ang = pos * inv_freq[None, :]
    even = (jnp.arange(model_dim) % 2 == 0)[None, :]
    pe_win = jnp.where(even, jnp.sin(ang), jnp.cos(ang))              # [W, model_dim]
    pe_win = pad2(pe_win, W, MD)
    if pe_invariant:
        pe = jnp.tile(pe_win, (tm // W, 1))                           # [tm, MD]
    else:
        pe = jnp.tile(pe_win, (pl.cdiv(M_pad, W), 1))[:M_pad]         # [M_pad, MD]

    out_dtype = jnp.bfloat16   # lean HBM writeback; the wrapper returns f32

    def build_and_call(single_buffer_weights):
        if single_buffer_weights:
            # Grid-invariant blocks never revolve -> single buffering halves their
            # VMEM footprint (important on v7x's 64 MiB VMEM).
            def const(shape):
                return pl.BlockSpec(shape, lambda g: (0, 0),
                                    pipeline_mode=pl.Buffered(1))
        else:
            def const(shape):
                return pl.BlockSpec(shape, lambda g: (0, 0))

        pe_spec = (const((tm, MD)) if pe_invariant
                   else pl.BlockSpec((tm, MD), lambda g: (g, 0)))

        out = pl.pallas_call(
            decoder_kernel,
            out_shape=jax.ShapeDtypeStruct((M_pad, F), out_dtype),
            grid_spec=pltpu.PrefetchScalarGridSpec(
                num_scalar_prefetch=0,
                grid=(grid,),
                in_specs=[
                    pl.BlockSpec((tm, H), lambda g: (g, 0)),   # x rows
                    const((H, MD)),                            # we (DataEmbedding)
                    const((MD, FF)),                           # w1
                    const((1, FF)),                            # b1
                    const((FF, MD)),                           # w2
                    const((1, MD)),                            # b2
                    const((MD, F)),                            # w3 (fc_mu)
                    const((1, F)),                             # b3
                    pe_spec,                                   # positional encoding
                ],
                out_specs=pl.BlockSpec((tm, F), lambda g: (g, 0)),
            ),
            compiler_params=pltpu.CompilerParams(
                dimension_semantics=("parallel",),
                vmem_limit_bytes=vmem_bytes,
            ),
        )(x, we, w1, b1, w2, b2, w3, b3, pe)
        return jax.block_until_ready(out)

    try:
        out = build_and_call(True)
    except Exception:
        # pipeline_mode=pl.Buffered(1) not supported by this JAX/Mosaic build:
        # fall back to default double-buffered grid-invariant blocks.
        out = build_and_call(False)

    return out[:M, :feature_num].astype(jnp.float32).reshape(B, W, feature_num)


if __name__ == "__main__":
    # Small shapes implied by the module: z is [batch, window_size, hidden_dim]
    B, window_size, feature_num = 2, 8, 4
    model_dim, ff_dim, hidden_dim = 32, 64, 16

    key = jax.random.PRNGKey(0)
    kz, kp = jax.random.split(key)
    z = jax.random.normal(kz, (B, window_size, hidden_dim), dtype=jnp.float32)
    params = init_decoder_params(kp, window_size, feature_num,
                                 model_dim, ff_dim, hidden_dim)

    mu = decoder_forward(z, params)
    jax.block_until_ready(mu)
    assert mu.shape == (B, window_size, feature_num)
    print("KERNEL_OK")
</pallas_src>

<mosaic_0001>
module attributes {stable_mosaic.version = 11 : i64} {
  func.func @decoder_kernel(%arg0: i32, %arg1: memref<16x16xbf16, #tpu.memory_space<vmem>>, %arg2: memref<16x128xbf16, #tpu.memory_space<vmem>>, %arg3: memref<128x128xbf16, #tpu.memory_space<vmem>>, %arg4: memref<1x128xf32, #tpu.memory_space<vmem>>, %arg5: memref<128x128xbf16, #tpu.memory_space<vmem>>, %arg6: memref<1x128xf32, #tpu.memory_space<vmem>>, %arg7: memref<128x4xbf16, #tpu.memory_space<vmem>>, %arg8: memref<1x4xf32, #tpu.memory_space<vmem>>, %arg9: memref<16x128xf32, #tpu.memory_space<vmem>>, %arg10: memref<16x4xbf16, #tpu.memory_space<vmem>>) attributes {dimension_semantics = [#tpu.dimension_semantics<parallel>], iteration_bounds = array<i64: 1>, scalar_prefetch = 0 : i64, scratch_operands = 0 : i64, tpu.core_type = #tpu.core_type<tc>, window_params = [{transform_indices = @transform_0, window_bounds = array<i64: 16, 16>}, {pipeline_mode = #tpu.pipeline_mode<synchronous>, transform_indices = @transform_1, window_bounds = array<i64: 16, 128>}, {pipeline_mode = #tpu.pipeline_mode<synchronous>, transform_indices = @transform_2, window_bounds = array<i64: 128, 128>}, {pipeline_mode = #tpu.pipeline_mode<synchronous>, transform_indices = @transform_3, window_bounds = array<i64: 1, 128>}, {pipeline_mode = #tpu.pipeline_mode<synchronous>, transform_indices = @transform_4, window_bounds = array<i64: 128, 128>}, {pipeline_mode = #tpu.pipeline_mode<synchronous>, transform_indices = @transform_5, window_bounds = array<i64: 1, 128>}, {pipeline_mode = #tpu.pipeline_mode<synchronous>, transform_indices = @transform_6, window_bounds = array<i64: 128, 4>}, {pipeline_mode = #tpu.pipeline_mode<synchronous>, transform_indices = @transform_7, window_bounds = array<i64: 1, 4>}, {pipeline_mode = #tpu.pipeline_mode<synchronous>, transform_indices = @transform_8, window_bounds = array<i64: 16, 128>}, {transform_indices = @transform_9, window_bounds = array<i64: 16, 4>}]} {
    %c0 = arith.constant 0 : index
    %c0_0 = arith.constant 0 : index
    %0 = vector.load %arg1[%c0, %c0_0] : memref<16x16xbf16, #tpu.memory_space<vmem>>, vector<16x16xbf16>
    %c0_1 = arith.constant 0 : index
    %c0_2 = arith.constant 0 : index
    %1 = vector.load %arg2[%c0_1, %c0_2] : memref<16x128xbf16, #tpu.memory_space<vmem>>, vector<16x128xbf16>
    %cst = arith.constant dense<0.000000e+00> : vector<16x128xf32>
    %2 = tpu.matmul %0, %1, %cst {dimension_numbers = #tpu.dot_dimension_numbers<[1], [0], [0], [1], [0, 0, 1, 1], [], []>} : vector<16x16xbf16>, vector<16x128xbf16>, vector<16x128xf32> -> vector<16x128xf32>
    %c0_3 = arith.constant 0 : index
    %c0_4 = arith.constant 0 : index
    %3 = vector.load %arg9[%c0_3, %c0_4] : memref<16x128xf32, #tpu.memory_space<vmem>>, vector<16x128xf32>
    %4 = arith.addf %2, %3 : vector<16x128xf32>
    %5 = arith.truncf %4 : vector<16x128xf32> to vector<16x128xbf16>
    %c0_5 = arith.constant 0 : index
    %c0_6 = arith.constant 0 : index
    %6 = vector.load %arg3[%c0_5, %c0_6] : memref<128x128xbf16, #tpu.memory_space<vmem>>, vector<128x128xbf16>
    %cst_7 = arith.constant dense<0.000000e+00> : vector<16x128xf32>
    %7 = tpu.matmul %5, %6, %cst_7 {dimension_numbers = #tpu.dot_dimension_numbers<[1], [0], [0], [1], [0, 0, 1, 1], [], []>} : vector<16x128xbf16>, vector<128x128xbf16>, vector<16x128xf32> -> vector<16x128xf32>
    %c0_8 = arith.constant 0 : index
    %c0_9 = arith.constant 0 : index
    %8 = vector.load %arg4[%c0_8, %c0_9] : memref<1x128xf32, #tpu.memory_space<vmem>>, vector<1x128xf32>
    %9 = vector.broadcast %8 : vector<1x128xf32> to vector<16x128xf32>
    %10 = arith.addf %7, %9 : vector<16x128xf32>
    %cst_10 = arith.constant 5.000000e-01 : f32
    %11 = vector.broadcast %cst_10 : f32 to vector<16x128xf32>
    %12 = arith.mulf %11, %10 : vector<16x128xf32>
    %cst_11 = arith.constant 0.707106769 : f32
    %13 = vector.broadcast %cst_11 : f32 to vector<16x128xf32>
    %14 = arith.mulf %10, %13 : vector<16x128xf32>
    %15 = math.erf %14 : vector<16x128xf32>
    %cst_12 = arith.constant 1.000000e+00 : f32
    %16 = vector.broadcast %cst_12 : f32 to vector<16x128xf32>
    %17 = arith.addf %16, %15 : vector<16x128xf32>
    %18 = arith.mulf %12, %17 : vector<16x128xf32>
    %19 = arith.truncf %18 : vector<16x128xf32> to vector<16x128xbf16>
    %c0_13 = arith.constant 0 : index
    %c0_14 = arith.constant 0 : index
    %20 = vector.load %arg5[%c0_13, %c0_14] : memref<128x128xbf16, #tpu.memory_space<vmem>>, vector<128x128xbf16>
    %cst_15 = arith.constant dense<0.000000e+00> : vector<16x128xf32>
    %21 = tpu.matmul %19, %20, %cst_15 {dimension_numbers = #tpu.dot_dimension_numbers<[1], [0], [0], [1], [0, 0, 1, 1], [], []>} : vector<16x128xbf16>, vector<128x128xbf16>, vector<16x128xf32> -> vector<16x128xf32>
    %c0_16 = arith.constant 0 : index
    %c0_17 = arith.constant 0 : index
    %22 = vector.load %arg6[%c0_16, %c0_17] : memref<1x128xf32, #tpu.memory_space<vmem>>, vector<1x128xf32>
    %23 = vector.broadcast %22 : vector<1x128xf32> to vector<16x128xf32>
    %24 = arith.addf %21, %23 : vector<16x128xf32>
    %cst_18 = arith.constant 5.000000e-01 : f32
    %25 = vector.broadcast %cst_18 : f32 to vector<16x128xf32>
    %26 = arith.mulf %25, %24 : vector<16x128xf32>
    %cst_19 = arith.constant 0.707106769 : f32
    %27 = vector.broadcast %cst_19 : f32 to vector<16x128xf32>
    %28 = arith.mulf %24, %27 : vector<16x128xf32>
    %29 = math.erf %28 : vector<16x128xf32>
    %cst_20 = arith.constant 1.000000e+00 : f32
    %30 = vector.broadcast %cst_20 : f32 to vector<16x128xf32>
    %31 = arith.addf %30, %29 : vector<16x128xf32>
    %32 = arith.mulf %26, %31 : vector<16x128xf32>
    %33 = arith.truncf %32 : vector<16x128xf32> to vector<16x128xbf16>
    %c0_21 = arith.constant 0 : index
    %c0_22 = arith.constant 0 : index
    %34 = vector.load %arg7[%c0_21, %c0_22] : memref<128x4xbf16, #tpu.memory_space<vmem>>, vector<128x4xbf16>
    %cst_23 = arith.constant dense<0.000000e+00> : vector<16x4xf32>
    %35 = tpu.matmul %33, %34, %cst_23 {dimension_numbers = #tpu.dot_dimension_numbers<[1], [0], [0], [1], [0, 0, 1, 1], [], []>} : vector<16x128xbf16>, vector<128x4xbf16>, vector<16x4xf32> -> vector<16x4xf32>
    %c0_24 = arith.constant 0 : index
    %c0_25 = arith.constant 0 : index
    %36 = vector.load %arg8[%c0_24, %c0_25] : memref<1x4xf32, #tpu.memory_space<vmem>>, vector<1x4xf32>
    %37 = vector.broadcast %36 : vector<1x4xf32> to vector<16x4xf32>
    %38 = arith.addf %35, %37 : vector<16x4xf32>
    %39 = arith.truncf %38 : vector<16x4xf32> to vector<16x4xbf16>
    %c0_26 = arith.constant 0 : index
    %c0_27 = arith.constant 0 : index
    %40 = vector.load %arg10[%c0_26, %c0_27] : memref<16x4xbf16, #tpu.memory_space<vmem>>, vector<16x4xbf16>
    tpu.vector_store %arg10[%c0_26, %c0_27], %39 {strides = array<i32>} : memref<16x4xbf16, #tpu.memory_space<vmem>>, vector<16x4xbf16>,
    return
  }
  func.func @transform_0(%arg0: i32) -> (i32, i32) {
    %c0_i32 = arith.constant 0 : i32
    %c0_i32_0 = arith.constant 0 : i32
    return %arg0, %c0_i32 : i32, i32
  }
  func.func @transform_1(%arg0: i32) -> (i32, i32) {
    %c0_i32 = arith.constant 0 : i32
    %c0_i32_0 = arith.constant 0 : i32
    %c0_i32_1 = arith.constant 0 : i32
    return %c0_i32, %c0_i32_0 : i32, i32
  }
  func.func @transform_2(%arg0: i32) -> (i32, i32) {
    %c0_i32 = arith.constant 0 : i32
    %c0_i32_0 = arith.constant 0 : i32
    %c0_i32_1 = arith.constant 0 : i32
    return %c0_i32, %c0_i32_0 : i32, i32
  }
  func.func @transform_3(%arg0: i32) -> (i32, i32) {
    %c0_i32 = arith.constant 0 : i32
    %c0_i32_0 = arith.constant 0 : i32
    %c0_i32_1 = arith.constant 0 : i32
    return %c0_i32, %c0_i32_0 : i32, i32
  }
  func.func @transform_4(%arg0: i32) -> (i32, i32) {
    %c0_i32 = arith.constant 0 : i32
    %c0_i32_0 = arith.constant 0 : i32
    %c0_i32_1 = arith.constant 0 : i32
    return %c0_i32, %c0_i32_0 : i32, i32
  }
  func.func @transform_5(%arg0: i32) -> (i32, i32) {
    %c0_i32 = arith.constant 0 : i32
    %c0_i32_0 = arith.constant 0 : i32
    %c0_i32_1 = arith.constant 0 : i32
    return %c0_i32, %c0_i32_0 : i32, i32
  }
  func.func @transform_6(%arg0: i32) -> (i32, i32) {
    %c0_i32 = arith.constant 0 : i32
    %c0_i32_0 = arith.constant 0 : i32
    %c0_i32_1 = arith.constant 0 : i32
    return %c0_i32, %c0_i32_0 : i32, i32
  }
  func.func @transform_7(%arg0: i32) -> (i32, i32) {
    %c0_i32 = arith.constant 0 : i32
    %c0_i32_0 = arith.constant 0 : i32
    %c0_i32_1 = arith.constant 0 : i32
    return %c0_i32, %c0_i32_0 : i32, i32
  }
  func.func @transform_8(%arg0: i32) -> (i32, i32) {
    %c0_i32 = arith.constant 0 : i32
    %c0_i32_0 = arith.constant 0 : i32
    %c0_i32_1 = arith.constant 0 : i32
    return %c0_i32, %c0_i32_0 : i32, i32
  }
  func.func @transform_9(%arg0: i32) -> (i32, i32) {
    %c0_i32 = arith.constant 0 : i32
    %c0_i32_0 = arith.constant 0 : i32
    return %arg0, %c0_i32 : i32, i32
  }
}

module attributes {stable_mosaic.version = 11 : i64} {
  func.func @decoder_kernel(%arg0: i32, %arg1: memref<16x16xbf16, #tpu.memory_space<vmem>>, %arg2: memref<16x128xbf16, #tpu.memory_space<vmem>>, %arg3: memref<128x128xbf16, #tpu.memory_space<vmem>>, %arg4: memref<1x128xf32, #tpu.memory_space<vmem>>, %arg5: memref<128x128xbf16, #tpu.memory_space<vmem>>, %arg6: memref<1x128xf32, #tpu.memory_space<vmem>>, %arg7: memref<128x4xbf16, #tpu.memory_space<vmem>>, %arg8: memref<1x4xf32, #tpu.memory_space<vmem>>, %arg9: memref<16x128xf32, #tpu.memory_space<vmem>>, %arg10: memref<16x4xbf16, #tpu.memory_space<vmem>>) attributes {dimension_semantics = [#tpu.dimension_semantics<parallel>], iteration_bounds = array<i64: 1>, scalar_prefetch = 0 : i64, scratch_operands = 0 : i64, tpu.core_type = #tpu.core_type<tc>, window_params = [{transform_indices = @transform_0, window_bounds = array<i64: 16, 16>}, {pipeline_mode = #tpu.pipeline_mode<synchronous>, transform_indices = @transform_1, window_bounds = array<i64: 16, 128>}, {pipeline_mode = #tpu.pipeline_mode<synchronous>, transform_indices = @transform_2, window_bounds = array<i64: 128, 128>}, {pipeline_mode = #tpu.pipeline_mode<synchronous>, transform_indices = @transform_3, window_bounds = array<i64: 1, 128>}, {pipeline_mode = #tpu.pipeline_mode<synchronous>, transform_indices = @transform_4, window_bounds = array<i64: 128, 128>}, {pipeline_mode = #tpu.pipeline_mode<synchronous>, transform_indices = @transform_5, window_bounds = array<i64: 1, 128>}, {pipeline_mode = #tpu.pipeline_mode<synchronous>, transform_indices = @transform_6, window_bounds = array<i64: 128, 4>}, {pipeline_mode = #tpu.pipeline_mode<synchronous>, transform_indices = @transform_7, window_bounds = array<i64: 1, 4>}, {pipeline_mode = #tpu.pipeline_mode<synchronous>, transform_indices = @transform_8, window_bounds = array<i64: 16, 128>}, {transform_indices = @transform_9, window_bounds = array<i64: 16, 4>}]} {
    %c0 = arith.constant 0 : index
    %c0_0 = arith.constant 0 : index
    %0 = vector.load %arg1[%c0, %c0_0] : memref<16x16xbf16, #tpu.memory_space<vmem>>, vector<16x16xbf16>
    %c0_1 = arith.constant 0 : index
    %c0_2 = arith.constant 0 : index
    %1 = vector.load %arg2[%c0_1, %c0_2] : memref<16x128xbf16, #tpu.memory_space<vmem>>, vector<16x128xbf16>
    %cst = arith.constant dense<0.000000e+00> : vector<16x128xf32>
    %2 = tpu.matmul %0, %1, %cst {dimension_numbers = #tpu.dot_dimension_numbers<[1], [0], [0], [1], [0, 0, 1, 1], [], []>} : vector<16x16xbf16>, vector<16x128xbf16>, vector<16x128xf32> -> vector<16x128xf32>
    %c0_3 = arith.constant 0 : index
    %c0_4 = arith.constant 0 : index
    %3 = vector.load %arg9[%c0_3, %c0_4] : memref<16x128xf32, #tpu.memory_space<vmem>>, vector<16x128xf32>
    %4 = arith.addf %2, %3 : vector<16x128xf32>
    %5 = arith.truncf %4 : vector<16x128xf32> to vector<16x128xbf16>
    %c0_5 = arith.constant 0 : index
    %c0_6 = arith.constant 0 : index
    %6 = vector.load %arg3[%c0_5, %c0_6] : memref<128x128xbf16, #tpu.memory_space<vmem>>, vector<128x128xbf16>
    %cst_7 = arith.constant dense<0.000000e+00> : vector<16x128xf32>
    %7 = tpu.matmul %5, %6, %cst_7 {dimension_numbers = #tpu.dot_dimension_numbers<[1], [0], [0], [1], [0, 0, 1, 1], [], []>} : vector<16x128xbf16>, vector<128x128xbf16>, vector<16x128xf32> -> vector<16x128xf32>
    %c0_8 = arith.constant 0 : index
    %c0_9 = arith.constant 0 : index
    %8 = vector.load %arg4[%c0_8, %c0_9] : memref<1x128xf32, #tpu.memory_space<vmem>>, vector<1x128xf32>
    %9 = vector.broadcast %8 : vector<1x128xf32> to vector<16x128xf32>
    %10 = arith.addf %7, %9 : vector<16x128xf32>
    %cst_10 = arith.constant 5.000000e-01 : f32
    %11 = vector.broadcast %cst_10 : f32 to vector<16x128xf32>
    %12 = arith.mulf %11, %10 : vector<16x128xf32>
    %cst_11 = arith.constant 0.707106769 : f32
    %13 = vector.broadcast %cst_11 : f32 to vector<16x128xf32>
    %14 = arith.mulf %10, %13 : vector<16x128xf32>
    %15 = math.erf %14 : vector<16x128xf32>
    %cst_12 = arith.constant 1.000000e+00 : f32
    %16 = vector.broadcast %cst_12 : f32 to vector<16x128xf32>
    %17 = arith.addf %16, %15 : vector<16x128xf32>
    %18 = arith.mulf %12, %17 : vector<16x128xf32>
    %19 = arith.truncf %18 : vector<16x128xf32> to vector<16x128xbf16>
    %c0_13 = arith.constant 0 : index
    %c0_14 = arith.constant 0 : index
    %20 = vector.load %arg5[%c0_13, %c0_14] : memref<128x128xbf16, #tpu.memory_space<vmem>>, vector<128x128xbf16>
    %cst_15 = arith.constant dense<0.000000e+00> : vector<16x128xf32>
    %21 = tpu.matmul %19, %20, %cst_15 {dimension_numbers = #tpu.dot_dimension_numbers<[1], [0], [0], [1], [0, 0, 1, 1], [], []>} : vector<16x128xbf16>, vector<128x128xbf16>, vector<16x128xf32> -> vector<16x128xf32>
    %c0_16 = arith.constant 0 : index
    %c0_17 = arith.constant 0 : index
    %22 = vector.load %arg6[%c0_16, %c0_17] : memref<1x128xf32, #tpu.memory_space<vmem>>, vector<1x128xf32>
    %23 = vector.broadcast %22 : vector<1x128xf32> to vector<16x128xf32>
    %24 = arith.addf %21, %23 : vector<16x128xf32>
    %cst_18 = arith.constant 5.000000e-01 : f32
    %25 = vector.broadcast %cst_18 : f32 to vector<16x128xf32>
    %26 = arith.mulf %25, %24 : vector<16x128xf32>
    %cst_19 = arith.constant 0.707106769 : f32
    %27 = vector.broadcast %cst_19 : f32 to vector<16x128xf32>
    %28 = arith.mulf %24, %27 : vector<16x128xf32>
    %29 = math.erf %28 : vector<16x128xf32>
    %cst_20 = arith.constant 1.000000e+00 : f32
    %30 = vector.broadcast %cst_20 : f32 to vector<16x128xf32>
    %31 = arith.addf %30, %29 : vector<16x128xf32>
    %32 = arith.mulf %26, %31 : vector<16x128xf32>
    %33 = arith.truncf %32 : vector<16x128xf32> to vector<16x128xbf16>
    %c0_21 = arith.constant 0 : index
    %c0_22 = arith.constant 0 : index
    %34 = vector.load %arg7[%c0_21, %c0_22] : memref<128x4xbf16, #tpu.memory_space<vmem>>, vector<128x4xbf16>
    %cst_23 = arith.constant dense<0.000000e+00> : vector<16x4xf32>
    %35 = tpu.matmul %33, %34, %cst_23 {dimension_numbers = #tpu.dot_dimension_numbers<[1], [0], [0], [1], [0, 0, 1, 1], [], []>} : vector<16x128xbf16>, vector<128x4xbf16>, vector<16x4xf32> -> vector<16x4xf32>
    %c0_24 = arith.constant 0 : index
    %c0_25 = arith.constant 0 : index
    %36 = vector.load %arg8[%c0_24, %c0_25] : memref<1x4xf32, #tpu.memory_space<vmem>>, vector<1x4xf32>
    %37 = vector.broadcast %36 : vector<1x4xf32> to vector<16x4xf32>
    %38 = arith.addf %35, %37 : vector<16x4xf32>
    %39 = arith.truncf %38 : vector<16x4xf32> to vector<16x4xbf16>
    %c0_26 = arith.constant 0 : index
    %c0_27 = arith.constant 0 : index
    %40 = vector.load %arg10[%c0_26, %c0_27] : memref<16x4xbf16, #tpu.memory_space<vmem>>, vector<16x4xbf16>
    tpu.vector_store %arg10[%c0_26, %c0_27], %39 {strides = array<i32>} : memref<16x4xbf16, #tpu.memory_space<vmem>>, vector<16x4xbf16>,
    return
  }
  func.func @transform_0(%arg0: i32) -> (i32, i32) {
    %c0_i32 = arith.constant 0 : i32
    %c0_i32_0 = arith.constant 0 : i32
    return %arg0, %c0_i32 : i32, i32
  }
  func.func @transform_1(%arg0: i32) -> (i32, i32) {
    %c0_i32 = arith.constant 0 : i32
    %c0_i32_0 = arith.constant 0 : i32
    %c0_i32_1 = arith.constant 0 : i32
    return %c0_i32, %c0_i32_0 : i32, i32
  }
  func.func @transform_2(%arg0: i32) -> (i32, i32) {
    %c0_i32 = arith.constant 0 : i32
    %c0_i32_0 = arith.constant 0 : i32
    %c0_i32_1 = arith.constant 0 : i32
    return %c0_i32, %c0_i32_0 : i32, i32
  }
  func.func @transform_3(%arg0: i32) -> (i32, i32) {
    %c0_i32 = arith.constant 0 : i32
    %c0_i32_0 = arith.constant 0 : i32
    %c0_i32_1 = arith.constant 0 : i32
    return %c0_i32, %c0_i32_0 : i32, i32
  }
  func.func @transform_4(%arg0: i32) -> (i32, i32) {
    %c0_i32 = arith.constant 0 : i32
    %c0_i32_0 = arith.constant 0 : i32
    %c0_i32_1 = arith.constant 0 : i32
    return %c0_i32, %c0_i32_0 : i32, i32
  }
  func.func @transform_5(%arg0: i32) -> (i32, i32) {
    %c0_i32 = arith.constant 0 : i32
    %c0_i32_0 = arith.constant 0 : i32
    %c0_i32_1 = arith.constant 0 : i32
    return %c0_i32, %c0_i32_0 : i32, i32
  }
  func.func @transform_6(%arg0: i32) -> (i32, i32) {
    %c0_i32 = arith.constant 0 : i32
    %c0_i32_0 = arith.constant 0 : i32
    %c0_i32_1 = arith.constant 0 : i32
    return %c0_i32, %c0_i32_0 : i32, i32
  }
  func.func @transform_7(%arg0: i32) -> (i32, i32) {
    %c0_i32 = arith.constant 0 : i32
    %c0_i32_0 = arith.constant 0 : i32
    %c0_i32_1 = arith.constant 0 : i32
    return %c0_i32, %c0_i32_0 : i32, i32
  }
  func.func @transform_8(%arg0: i32) -> (i32, i32) {
    %c0_i32 = arith.constant 0 : i32
    %c0_i32_0 = arith.constant 0 : i32
    %c0_i32_1 = arith.constant 0 : i32
    return %c0_i32, %c0_i32_0 : i32, i32
  }
  func.func @transform_9(%arg0: i32) -> (i32, i32) {
    %c0_i32 = arith.constant 0 : i32
    %c0_i32_0 = arith.constant 0 : i32
    return %arg0, %c0_i32 : i32, i32
  }
}

</mosaic_0001>

<bundles_post_ra>
// kernel: tpu_custom_call.1
= control target key start
LH: loop header
LB: loop body
LE: loop exit
PB: predicated region body
PF: predicated region fallthrough
CT: control target
= control target key end

     0   :  { %14 = vsyncpa [#allocation3], 0  ;;  %s993_s0 = inlined_call_operand.hbm [shape: bf16[16,16], index: 0, kind: input, shape index: {}]   ;;  %s994_s1 = inlined_call_operand.hbm [shape: bf16[16,128], index: 1, kind: input, shape index: {}]   ;;  %s995_s2 = inlined_call_operand.vmem [shape: bf16[128,128], index: 2, kind: input, shape index: {}]   ;;  %s996_s3 = inlined_call_operand.vmem [shape: f32[1,128], index: 3, kind: input, shape index: {}]   ;;  %s997_s4 = inlined_call_operand.hbm [shape: bf16[128,128], index: 4, kind: input, shape index: {}]   ;;  %s998_s5 = inlined_call_operand.vmem [shape: f32[1,128], index: 5, kind: input, shape index: {}]   ;;  %s999_s6 = inlined_call_operand.vmem [shape: bf16[128,4], index: 6, kind: input, shape index: {}]   ;;  %s1000_s7 = inlined_call_operand.vmem [shape: f32[1,4], index: 7, kind: input, shape index: {}]   ;;  %s1001_s8 = inlined_call_operand.hbm [shape: f32[16,128], index: 8, kind: input, shape index: {}]   ;;  %s1002_s9 = inlined_call_operand.vmem [shape: bf16[16,4], index: 9, kind: output, shape index: {}]  }
   0x1   :  { %15 = vsyncpa [#allocation5], 0 }
   0x2   :  { %16 = vsyncpa [#allocation8], 0  ;;  %s34_s11 = sshll.u32 %s994_s1, 4  ;;  %s824_s12 = smov [#allocation4]   ;;  %s35_s11 = int_to_ptr.hbm [resolvable:$true] %s34_s11 }
   0x3   :  { %s36_s13 = sshll.u32 %s824_s12, 4  ;;  %s21_s16 = sshll.u32 %s993_s0, 4  ;;  %s37_s13 = int_to_ptr.vmem [resolvable:$true] %s36_s13  ;;  %s22_s16 = int_to_ptr.hbm [resolvable:$true] %s21_s16 }
   0x4   :  { %s825_s17 = smov 64   ;;  %s826_s18 = smov 4  }
   0x5   :  { %42 = dma.hbm_to_vmem [thread:$0]  %s35_s11, 128, %s37_s13, [#allocation5], %s825_s17, %s825_s17, %s826_s18  }
   0x6   :  { %s827_s19 = smov [#allocation2]   ;;  %s51_s23 = sshll.u32 %s997_s4, 4  ;;  %s52_s23 = int_to_ptr.hbm [resolvable:$true] %s51_s23 }
   0x7   :  { %s23_s20 = sshll.u32 %s827_s19, 4  ;;  %s70_s25 = sshll.u32 %s1001_s8, 4  ;;  %s24_s20 = int_to_ptr.vmem [resolvable:$true] %s23_s20  ;;  %s71_s25 = int_to_ptr.hbm [resolvable:$true] %s70_s25 }
   0x8   :  { %29 = dma.hbm_to_vmem [thread:$0]  %s22_s16, 128, %s24_s20, [#allocation3], %s825_s17, %s825_s17, %s826_s18  }
   0x9   :  { %s828_s26 = smov [#allocation6]   ;;  %s829_s0 = smov [#allocation7]  }
   0xa   :  { %s53_s27 = sshll.u32 %s828_s26, 4  ;;  %s72_s28 = sshll.u32 %s829_s0, 4  ;;  %s54_s27 = int_to_ptr.vmem [resolvable:$true] %s53_s27  ;;  %s73_s28 = int_to_ptr.vmem [resolvable:$true] %s72_s28 }
   0xb   :  { %59 = dma.hbm_to_vmem [thread:$0]  %s52_s23, 1024, %s54_s27, [#allocation5], %s825_s17, %s825_s17, %s826_s18  }
   0xc   :  { %s830_s29 = smov 128   ;;  %s831_s30 = smov 8  }
   0xd   :  { %78 = dma.hbm_to_vmem [thread:$0]  %s71_s25, 256, %s73_s28, [#allocation8], %s830_s29, %s830_s29, %s831_s30  }
   0xe   :  { %818 = dma.done.wait [#allocation3], 128  }
   0xf   :  { %819 = vsyncadd [#allocation3], 4294967168 }
  0x10   :  { %820 = dma.done.wait [#allocation5], 1152  }
  0x11   :  { %821 = vsyncadd [#allocation5], 4294966144 }
  0x12   :  { %822 = dma.done.wait [#allocation8], 256  }
  0x13   :  { %823 = vsyncadd [#allocation8], 4294967040  ;;  %v678_v0 = vld [vmem:[#allocation4] sm:$0xff]  ;;  %v686_v1 = vld [vmem:[%s995_s2 + $0x38] sm:$0xff]  ;;  %vm113_vm0 = vcmask 130048  }
  0x14   :  { %v677_v2 = vld [vmem:[#allocation2] sm:$0xff]  ;;  %124 = vmatpush.bf16.msra.mxu0 %v678_v0  ;;  %200 = vmatpush.bf16.msra.mxu1 %v686_v1  ;;  %v685_v3 = vld [vmem:[%s995_s2 + $0x30] sm:$0xff]  ;;  %v684_v4 = vld [vmem:[%s995_s2 + $0x28] sm:$0xff] }
  0x15   :  { %v683_v5 = vld [vmem:[%s995_s2 + $0x20] sm:$0xff]  ;;  %v682_v6 = vld [vmem:[%s995_s2 + $0x18] sm:$0xff]  ;;  %v681_v7 = vld [vmem:[%s995_s2 + $0x10] sm:$0xff] }
  0x16   :  { %v680_v8 = vld [vmem:[%s995_s2 + $0x8] sm:$0xff]  ;;  %v679_v9 = vld [vmem:[%s995_s2] sm:$0xff]  ;;  %v100_v11 = vld [vmem:[#allocation7] sm:$0xff] }
  0x17   :  { %576 = vmatmul.msk.bf16.vlgmr.msra.gmra.mxu0 %vm113_vm0, %v677_v2  ;;  %v101_v12 = vld [vmem:[#allocation7 + $0x8] sm:$0xff]  ;;  %v711_v17 = vld [vmem:[%s996_s3] ss:$0 sm:$0xff]  ;;  %v694_v18 = vld [vmem:[#allocation6 + $0x38] sm:$0xff] }
  0x18   :  { %201 = vmatpush.bf16.msra.mxu1 %v685_v3  ;;  %371 = vmatpush.bf16.msra.mxu2 %v694_v18  ;;  %v693_v22 = vld [vmem:[#allocation6 + $0x30] sm:$0xff]  ;;  %v692_v24 = vld [vmem:[#allocation6 + $0x28] sm:$0xff]  ;;  %v691_v29 = vld [vmem:[#allocation6 + $0x20] sm:$0xff] }
  0x19   :  { %v690_v35 = vld [vmem:[#allocation6 + $0x18] sm:$0xff]  ;;  %v689_v41 = vld [vmem:[#allocation6 + $0x10] sm:$0xff]  ;;  %v688_v49 = vld [vmem:[#allocation6 + $0x8] sm:$0xff] }
  0x1a   :  { %v687_v56 = vld [vmem:[#allocation6] sm:$0xff] }
  0x1c   :  { %202 = vmatpush.bf16.msra.mxu1 %v684_v4  ;;  %372 = vmatpush.bf16.msra.mxu2 %v693_v22 }
  0x20   :  { %203 = vmatpush.bf16.msra.mxu1 %v683_v5  ;;  %373 = vmatpush.bf16.msra.mxu2 %v692_v24 }
  0x24   :  { %204 = vmatpush.bf16.msra.mxu1 %v682_v6  ;;  %374 = vmatpush.bf16.msra.mxu2 %v691_v29 }
  0x28   :  { %205 = vmatpush.bf16.msra.mxu1 %v681_v7  ;;  %375 = vmatpush.bf16.msra.mxu2 %v690_v35 }
  0x2c   :  { %206 = vmatpush.bf16.msra.mxu1 %v680_v8  ;;  %376 = vmatpush.bf16.msra.mxu2 %v689_v41 }
  0x30   :  { %207 = vmatpush.bf16.msra.mxu1 %v679_v9  ;;  %377 = vmatpush.bf16.msra.mxu2 %v688_v49  ;;  %v702_v49 = vld [vmem:[%s999_s6 + $0x38] sm:$0xff] }
  0x31   :  { %542 = vmatpush.bf16.msra.mxu3 %v702_v49 }
  0x34   :  { %378 = vmatpush.bf16.msra.mxu2 %v687_v56 }
  0x94   :  { %v126_v10 = vpop.f32.mrf.mxu0 }
  0x95   :  { %v127_v14 = vadd.f32 %v126_v10, %v100_v11 }
  0x9c   :  { %v128_v13 = vpop.f32.mrf.mxu0 }
  0x9d   :  { %v129_v15 = vadd.f32 %v128_v13, %v101_v12 }
  0x9f   :  { %v131_v16 = vpack.c.bf16 %v129_v15, %v127_v14 }
  0xa1   :  { %208 = vmatmul.bf16.vlgmr.msra.gmra.mxu1 %v131_v16 }
 0x11e   :  { %v209_v19 = vpop.f32.mrf.mxu1 }
 0x11f   :  { %v921_v20 = vadd.f32 %v711_v17, %v209_v19 }
 0x121   :  { %v924_v21 = vmul.f32 0.70710677, %v921_v20 }
 0x123   :  { %v218_v23 = vmul.f32 %v924_v21, %v924_v21 }
 0x125   :  { %v219_v25 = vmin.f32 %v218_v23, 16.0 }
 0x126   :  { %v211_v26 = vpop.f32.mrf.mxu1 }
 0x127   :  { %v220_v27 = vmul.f32 2.1237322e-06, %v219_v25  ;;  %v928_v28 = vadd.f32 %v711_v17, %v211_v26  ;;  %v231_v30 = vmul.f32 3.8918573e-05, %v219_v25 }
 0x129   :  { %v221_v31 = vadd.f32 0.00028619796, %v220_v27  ;;  %v931_v32 = vmul.f32 0.70710677, %v928_v28  ;;  %v232_v33 = vadd.f32 0.001143296, %v231_v30 }
 0x12b   :  { %v258_v34 = vmul.f32 %v931_v32, %v931_v32  ;;  %v222_v36 = vmul.f32 %v221_v31, %v219_v25  ;;  %v233_v37 = vmul.f32 %v232_v33, %v219_v25 }
 0x12d   :  { %v259_v38 = vmin.f32 %v258_v34, 16.0  ;;  %v234_v39 = vadd.f32 0.014752088, %v233_v37  ;;  %v223_v43 = vadd.f32 0.0036580483, %v222_v36 }
 0x12f   :  { %v260_v40 = vmul.f32 2.1237322e-06, %v259_v38  ;;  %v271_v42 = vmul.f32 3.8918573e-05, %v259_v38  ;;  %v235_v44 = vmul.f32 %v234_v39, %v219_v25  ;;  %v224_v51 = vmul.f32 %v223_v43, %v219_v25 }
 0x130   :  { %v215_v43 = vmul.f32 0.5, %v928_v28  ;;  %v701_v28 = vld [vmem:[%s999_s6 + $0x30] sm:$0xff] }
 0x131   :  { %v261_v45 = vadd.f32 0.00028619796, %v260_v40  ;;  %v272_v46 = vadd.f32 0.001143296, %v271_v42  ;;  %v236_v47 = vadd.f32 0.112945676, %v235_v44  ;;  %543 = vmatpush.bf16.msra.mxu3 %v701_v28 }
 0x132   :  { %v225_v58 = vadd.f32 0.05243302, %v224_v51  ;;  %v214_v42 = vmul.f32 0.5, %v921_v20 }
 0x133   :  { %v262_v48 = vmul.f32 %v261_v45, %v259_v38  ;;  %v273_v50 = vmul.f32 %v272_v46, %v259_v38  ;;  %v237_v52 = vmul.f32 %v236_v47, %v219_v25 }
 0x134   :  { %v226_v0 = vmul.f32 %v225_v58, %v219_v25  ;;  %v699_v58 = vld [vmem:[%s999_s6 + $0x20] sm:$0xff] }
 0x135   :  { %v263_v53 = vadd.f32 0.0036580483, %v262_v48  ;;  %v274_v54 = vadd.f32 0.014752088, %v273_v50  ;;  %v238_v55 = vadd.f32 0.4994258, %v237_v52 }
 0x136   :  { %v227_v4 = vadd.f32 0.18741608, %v226_v0  ;;  %v700_v52 = vld [vmem:[%s999_s6 + $0x28] sm:$0xff]  ;;  %v698_v0 = vld [vmem:[%s999_s6 + $0x18] sm:$0xff] }
 0x137   :  { %v275_v57 = vmul.f32 %v274_v54, %v259_v38  ;;  %v239_v59 = vmul.f32 %v238_v55, %v219_v25  ;;  %v264_v60 = vmul.f32 %v263_v53, %v259_v38  ;;  %544 = vmatpush.bf16.msra.mxu3 %v700_v52 }
 0x138   :  { %v228_v9 = vmul.f32 %v227_v4, %v219_v25 }
 0x139   :  { %v276_v61 = vadd.f32 0.112945676, %v275_v57  ;;  %v240_v62 = vadd.f32 1.0, %v239_v59  ;;  %v265_v1 = vadd.f32 0.05243302, %v264_v60 }
 0x13a   :  { %v229_v15 = vadd.f32 1.1283791, %v228_v9 }
 0x13b   :  { %v277_v63 = vmul.f32 %v276_v61, %v259_v38  ;;  %714 = vrcp.f32 %v240_v62  ;;  %v266_v5 = vmul.f32 %v265_v1, %v259_v38  ;;  %v252_v12 = vand.u32 2147483648, %v240_v62  ;;  %545 = vmatpush.bf16.msra.mxu3 %v699_v58 }
 0x13c   :  { %v250_v14 = vand.u32 2147483647, %v240_v62  ;;  %vm246_vm2 = vweird.f32 %v240_v62  ;;  %v230_v24 = vmul.f32 %v229_v15, %v924_v21  ;;  %v696_v15 = vld [vmem:[%s999_s6 + $0x8] sm:$0xff] }
 0x13d   :  { %v278_v2 = vadd.f32 0.4994258, %v277_v63  ;;  %v267_v10 = vadd.f32 0.18741608, %v266_v5  ;;  %v253_v19 = vor.u32 1.1754944e-38, %v252_v12 }
 0x13e   :  { %vm251_vm4 = vcmp.eq.f32.partialorder %v250_v14, 8.507059e+37 }
 0x13f   :  { %v279_v3 = vmul.f32 %v278_v2, %v259_v38  ;;  %v268_v17 = vmul.f32 %v267_v10, %v259_v38  ;;  %546 = vmatpush.bf16.msra.mxu3 %v698_v0 }
 0x141   :  { %v280_v6 = vadd.f32 1.0, %v279_v3  ;;  %v715_v7 = vpop.eup %714  ;;  %v269_v27 = vadd.f32 1.1283791, %v268_v17 }
 0x142   :  { %v242_v8 = vmul.f32 %v715_v7, %v240_v62  ;;  %vm247_vm1 = vweird.f32 %v715_v7 }
 0x143   :  { %716 = vrcp.f32 %v280_v6  ;;  %vm248_vm3 = vmor %vm246_vm2, %vm247_vm1  ;;  %v292_v29 = vand.u32 2147483648, %v280_v6  ;;  %v290_v33 = vand.u32 2147483647, %v280_v6  ;;  %vm286_vm6 = vweird.f32 %v280_v6 }
 0x144   :  { %v243_v11 = vsub.f32 1.0, %v242_v8  ;;  %v270_v36 = vmul.f32 %v269_v27, %v931_v32  ;;  %v712_v32 = vld [vmem:[%s998_s5] ss:$0 sm:$0xff]  ;;  %vm558_vm1 = vcmask 27648  }
 0x145   :  { %v293_v35 = vor.u32 1.1754944e-38, %v292_v29  ;;  %vm291_vm8 = vcmp.eq.f32.partialorder %v290_v33, 8.507059e+37 }
 0x146   :  { %v244_v13 = vmul.f32 %v715_v7, %v243_v11 }
 0x148   :  { %v245_v18 = vadd.f32 %v715_v7, %v244_v13 }
 0x149   :  { %v717_v16 = vpop.eup %716 }
 0x14a   :  { %v282_v22 = vmul.f32 %v717_v16, %v280_v6  ;;  %v249_v23 = vsel %vm248_vm3, %v715_v7, %v245_v18  ;;  %vm287_vm5 = vweird.f32 %v717_v16  ;;  %v697_v7 = vld [vmem:[%s999_s6 + $0x10] sm:$0xff] }
 0x14b   :  { %v254_v26 = vsel %vm251_vm4, %v253_v19, %v249_v23  ;;  %vm288_vm7 = vmor %vm286_vm6, %vm287_vm5  ;;  %547 = vmatpush.bf16.msra.mxu3 %v697_v7 }
 0x14c   :  { %v283_v25 = vsub.f32 1.0, %v282_v22  ;;  %v255_v30 = vmul.f32 %v254_v26, %v230_v24  ;;  %v695_v24 = vld [vmem:[%s999_s6] sm:$0xff] }
 0x14e   :  { %v284_v31 = vmul.f32 %v717_v16, %v283_v25  ;;  %v609_v37 = vclamps-f32 %v255_v30, 1.0 }
 0x14f   :  { %548 = vmatpush.bf16.msra.mxu3 %v696_v15 }
 0x150   :  { %v285_v34 = vadd.f32 %v717_v16, %v284_v31  ;;  %v298_v41 = vadd.f32 1.0, %v609_v37 }
 0x152   :  { %v289_v38 = vsel %vm288_vm7, %v717_v16, %v285_v34  ;;  %v300_v45 = vmul.f32 %v298_v41, %v214_v42 }
 0x153   :  { %v294_v39 = vsel %vm291_vm8, %v293_v35, %v289_v38  ;;  %549 = vmatpush.bf16.msra.mxu3 %v695_v24 }
 0x154   :  { %v295_v40 = vmul.f32 %v294_v39, %v270_v36 }
 0x156   :  { %v610_v21 = vclamps-f32 %v295_v40, 1.0 }
 0x158   :  { %v299_v44 = vadd.f32 1.0, %v610_v21 }
 0x15a   :  { %v301_v46 = vmul.f32 %v299_v44, %v215_v43 }
 0x15c   :  { %v302_v47 = vpack.c.bf16 %v301_v46, %v300_v45 }
 0x15e   :  { %379 = vmatmul.bf16.vlgmr.msra.gmra.mxu2 %v302_v47 }
 0x1e1   :  { %v380_v48 = vpop.f32.mrf.mxu2 }
 0x1e2   :  { %v945_v50 = vadd.f32 %v712_v32, %v380_v48 }
 0x1e4   :  { %v948_v20 = vmul.f32 0.70710677, %v945_v50 }
 0x1e6   :  { %v389_v51 = vmul.f32 %v948_v20, %v948_v20 }
 0x1e8   :  { %v390_v53 = vmin.f32 %v389_v51, 16.0 }
 0x1e9   :  { %v382_v54 = vpop.f32.mrf.mxu2 }
 0x1ea   :  { %v391_v55 = vmul.f32 2.1237322e-06, %v390_v53  ;;  %v958_v56 = vadd.f32 %v712_v32, %v382_v54  ;;  %v402_v57 = vmul.f32 3.8918573e-05, %v390_v53 }
 0x1ec   :  { %v392_v59 = vadd.f32 0.00028619796, %v391_v55  ;;  %v964_v60 = vmul.f32 0.70710677, %v958_v56  ;;  %v403_v61 = vadd.f32 0.001143296, %v402_v57 }
 0x1ed   :  { %v386_v7 = vmul.f32 0.5, %v958_v56 }
 0x1ee   :  { %v429_v62 = vmul.f32 %v964_v60, %v964_v60  ;;  %v393_v63 = vmul.f32 %v392_v59, %v390_v53  ;;  %v404_v1 = vmul.f32 %v403_v61, %v390_v53 }
 0x1f0   :  { %v430_v2 = vmin.f32 %v429_v62, 16.0  ;;  %v405_v3 = vadd.f32 0.014752088, %v404_v1  ;;  %v394_v6 = vadd.f32 0.0036580483, %v393_v63 }
 0x1f2   :  { %v431_v4 = vmul.f32 2.1237322e-06, %v430_v2  ;;  %v442_v5 = vmul.f32 3.8918573e-05, %v430_v2  ;;  %v406_v8 = vmul.f32 %v405_v3, %v390_v53  ;;  %v395_v14 = vmul.f32 %v394_v6, %v390_v53 }
 0x1f3   :  { %v385_v6 = vmul.f32 0.5, %v945_v50 }
 0x1f4   :  { %v432_v9 = vadd.f32 0.00028619796, %v431_v4  ;;  %v443_v10 = vadd.f32 0.001143296, %v442_v5  ;;  %v407_v11 = vadd.f32 0.112945676, %v406_v8 }
 0x1f5   :  { %v396_v23 = vadd.f32 0.05243302, %v395_v14 }
 0x1f6   :  { %v433_v12 = vmul.f32 %v432_v9, %v430_v2  ;;  %v444_v13 = vmul.f32 %v443_v10, %v430_v2  ;;  %v408_v16 = vmul.f32 %v407_v11, %v390_v53 }
 0x1f7   :  { %v397_v31 = vmul.f32 %v396_v23, %v390_v53 }
 0x1f8   :  { %v434_v17 = vadd.f32 0.0036580483, %v433_v12  ;;  %v445_v18 = vadd.f32 0.014752088, %v444_v13  ;;  %v409_v19 = vadd.f32 0.4994258, %v408_v16 }
 0x1f9   :  { %v398_v36 = vadd.f32 0.18741608, %v397_v31 }
 0x1fa   :  { %v446_v22 = vmul.f32 %v445_v18, %v430_v2  ;;  %v410_v26 = vmul.f32 %v409_v19, %v390_v53  ;;  %v435_v25 = vmul.f32 %v434_v17, %v430_v2 }
 0x1fb   :  { %v399_v21 = vmul.f32 %v398_v36, %v390_v53 }
 0x1fc   :  { %v447_v27 = vadd.f32 0.112945676, %v446_v22  ;;  %v411_v29 = vadd.f32 1.0, %v410_v26  ;;  %v436_v33 = vadd.f32 0.05243302, %v435_v25 }
 0x1fd   :  { %v400_v46 = vadd.f32 1.1283791, %v399_v21 }
 0x1fe   :  { %v448_v30 = vmul.f32 %v447_v27, %v430_v2  ;;  %718 = vrcp.f32 %v411_v29  ;;  %v437_v37 = vmul.f32 %v436_v33, %v430_v2  ;;  %v423_v43 = vand.u32 2147483648, %v411_v29 }
 0x1ff   :  { %v421_v45 = vand.u32 2147483647, %v411_v29  ;;  %vm417_vm10 = vweird.f32 %v411_v29  ;;  %v401_v52 = vmul.f32 %v400_v46, %v948_v20 }
 0x200   :  { %v449_v34 = vadd.f32 0.4994258, %v448_v30  ;;  %v438_v41 = vadd.f32 0.18741608, %v437_v37  ;;  %v424_v49 = vor.u32 1.1754944e-38, %v423_v43 }
 0x201   :  { %vm422_vm12 = vcmp.eq.f32.partialorder %v421_v45, 8.507059e+37 }
 0x202   :  { %v450_v35 = vmul.f32 %v449_v34, %v430_v2  ;;  %v439_v32 = vmul.f32 %v438_v41, %v430_v2 }
 0x204   :  { %v451_v38 = vadd.f32 1.0, %v450_v35  ;;  %v719_v39 = vpop.eup %718  ;;  %v440_v55 = vadd.f32 1.1283791, %v439_v32 }
 0x205   :  { %v413_v40 = vmul.f32 %v719_v39, %v411_v29  ;;  %vm418_vm9 = vweird.f32 %v719_v39 }
 0x206   :  { %720 = vrcp.f32 %v451_v38  ;;  %vm419_vm11 = vmor %vm417_vm10, %vm418_vm9  ;;  %v463_v57 = vand.u32 2147483648, %v451_v38  ;;  %v461_v61 = vand.u32 2147483647, %v451_v38  ;;  %vm457_vm14 = vweird.f32 %v451_v38 }
 0x207   :  { %v414_v42 = vsub.f32 1.0, %v413_v40  ;;  %v441_v0 = vmul.f32 %v440_v55, %v964_v60  ;;  %v713_v60 = vld [vmem:[%s1000_s7] ss:$0 sm:$0xff] }
 0x208   :  { %v464_v63 = vor.u32 1.1754944e-38, %v463_v57  ;;  %vm462_vm0 = vcmp.eq.f32.partialorder %v461_v61, 8.507059e+37 }
 0x209   :  { %v415_v44 = vmul.f32 %v719_v39, %v414_v42 }
 0x20b   :  { %v416_v48 = vadd.f32 %v719_v39, %v415_v44 }
 0x20c   :  { %v721_v47 = vpop.eup %720 }
 0x20d   :  { %v453_v28 = vmul.f32 %v721_v47, %v451_v38  ;;  %v420_v51 = vsel %vm419_vm11, %v719_v39, %v416_v48  ;;  %vm458_vm13 = vweird.f32 %v721_v47 }
 0x20e   :  { %v425_v54 = vsel %vm422_vm12, %v424_v49, %v420_v51  ;;  %vm459_vm15 = vmor %vm457_vm14, %vm458_vm13 }
 0x20f   :  { %v454_v53 = vsub.f32 1.0, %v453_v28  ;;  %v426_v58 = vmul.f32 %v425_v54, %v401_v52 }
 0x211   :  { %v455_v59 = vmul.f32 %v721_v47, %v454_v53  ;;  %v643_v1 = vclamps-f32 %v426_v58, 1.0 }
 0x213   :  { %v456_v62 = vadd.f32 %v721_v47, %v455_v59  ;;  %v469_v5 = vadd.f32 1.0, %v643_v1 }
 0x215   :  { %v460_v2 = vsel %vm459_vm15, %v721_v47, %v456_v62  ;;  %v471_v9 = vmul.f32 %v469_v5, %v385_v6 }
 0x216   :  { %v465_v3 = vsel %vm462_vm0, %v464_v63, %v460_v2 }
 0x217   :  { %v466_v4 = vmul.f32 %v465_v3, %v441_v0 }
 0x219   :  { %v644_v20 = vclamps-f32 %v466_v4, 1.0 }
 0x21b   :  { %v470_v8 = vadd.f32 1.0, %v644_v20 }
 0x21d   :  { %v472_v10 = vmul.f32 %v470_v8, %v386_v7 }
 0x21f   :  { %v473_v11 = vpack.c.bf16 %v472_v10, %v471_v9 }
 0x221   :  { %550 = vmatmul.bf16.vlgmr.msra.gmra.mxu3 %v473_v11 }
 0x2a4   :  { %v551_v12 = vpop.f32.mrf.mxu3 }
 0x2a5   :  { %v552_v13 = vadd.f32 %v713_v60, %v551_v12 }
 0x2a7   :  { %v556_v14 = vpack.c.bf16 %v552_v13, %v552_v13 }
 0x2a9   :  { %559 = vst.msk [vmem:[%s1002_s9] sm:$0xf] %vm558_vm1, %v556_v14 }
 0x2ac   :  { %v553_v50 = vpop.f32.mrf.mxu3 }
 0x2ad   :  { %v554_v15 = vadd.f32 %v713_v60, %v553_v50 }
 0x2af   :  { %v557_v56 = vpack.c.bf16 %v554_v15, %v554_v15 }
 0x2b1   :  { %560 = vst.msk [vmem:[%s1002_s9 + $0x4] sm:$0xf] %vm558_vm1, %v557_v56 }
 0x2b2   :  { %565 = vsyncpa [#allocation3], 1 }
 0x2b3   :  { %566 = vsyncpa [#allocation5], 1 }
 0x2b4   :  { %567 = vsyncpa [#allocation8], 1 }

// kernel: tpu_custom_call.1
= control target key start
LH: loop header
LB: loop body
LE: loop exit
PB: predicated region body
PF: predicated region fallthrough
CT: control target
= control target key end

     0   :  { %14 = vsyncpa [#allocation3], 0  ;;  %s993_s0 = inlined_call_operand.hbm [shape: bf16[16,16], index: 0, kind: input, shape index: {}]   ;;  %s994_s1 = inlined_call_operand.hbm [shape: bf16[16,128], index: 1, kind: input, shape index: {}]   ;;  %s995_s2 = inlined_call_operand.vmem [shape: bf16[128,128], index: 2, kind: input, shape index: {}]   ;;  %s996_s3 = inlined_call_operand.vmem [shape: f32[1,128], index: 3, kind: input, shape index: {}]   ;;  %s997_s4 = inlined_call_operand.hbm [shape: bf16[128,128], index: 4, kind: input, shape index: {}]   ;;  %s998_s5 = inlined_call_operand.vmem [shape: f32[1,128], index: 5, kind: input, shape index: {}]   ;;  %s999_s6 = inlined_call_operand.vmem [shape: bf16[128,4], index: 6, kind: input, shape index: {}]   ;;  %s1000_s7 = inlined_call_operand.vmem [shape: f32[1,4], index: 7, kind: input, shape index: {}]   ;;  %s1001_s8 = inlined_call_operand.hbm [shape: f32[16,128], index: 8, kind: input, shape index: {}]   ;;  %s1002_s9 = inlined_call_operand.vmem [shape: bf16[16,4], index: 9, kind: output, shape index: {}]  }
   0x1   :  { %15 = vsyncpa [#allocation5], 0 }
   0x2   :  { %16 = vsyncpa [#allocation8], 0  ;;  %s34_s11 = sshll.u32 %s994_s1, 4  ;;  %s824_s12 = smov [#allocation4]   ;;  %s35_s11 = int_to_ptr.hbm [resolvable:$true] %s34_s11 }
   0x3   :  { %s36_s13 = sshll.u32 %s824_s12, 4  ;;  %s21_s16 = sshll.u32 %s993_s0, 4  ;;  %s37_s13 = int_to_ptr.vmem [resolvable:$true] %s36_s13  ;;  %s22_s16 = int_to_ptr.hbm [resolvable:$true] %s21_s16 }
   0x4   :  { %s825_s17 = smov 64   ;;  %s826_s18 = smov 4  }
   0x5   :  { %42 = dma.hbm_to_vmem [thread:$0]  %s35_s11, 128, %s37_s13, [#allocation5], %s825_s17, %s825_s17, %s826_s18  }
   0x6   :  { %s827_s19 = smov [#allocation2]   ;;  %s51_s23 = sshll.u32 %s997_s4, 4  ;;  %s52_s23 = int_to_ptr.hbm [resolvable:$true] %s51_s23 }
   0x7   :  { %s23_s20 = sshll.u32 %s827_s19, 4  ;;  %s70_s25 = sshll.u32 %s1001_s8, 4  ;;  %s24_s20 = int_to_ptr.vmem [resolvable:$true] %s23_s20  ;;  %s71_s25 = int_to_ptr.hbm [resolvable:$true] %s70_s25 }
   0x8   :  { %29 = dma.hbm_to_vmem [thread:$0]  %s22_s16, 128, %s24_s20, [#allocation3], %s825_s17, %s825_s17, %s826_s18  }
   0x9   :  { %s828_s26 = smov [#allocation6]   ;;  %s829_s0 = smov [#allocation7]  }
   0xa   :  { %s53_s27 = sshll.u32 %s828_s26, 4  ;;  %s72_s28 = sshll.u32 %s829_s0, 4  ;;  %s54_s27 = int_to_ptr.vmem [resolvable:$true] %s53_s27  ;;  %s73_s28 = int_to_ptr.vmem [resolvable:$true] %s72_s28 }
   0xb   :  { %59 = dma.hbm_to_vmem [thread:$0]  %s52_s23, 1024, %s54_s27, [#allocation5], %s825_s17, %s825_s17, %s826_s18  }
   0xc   :  { %s830_s29 = smov 128   ;;  %s831_s30 = smov 8  }
   0xd   :  { %78 = dma.hbm_to_vmem [thread:$0]  %s71_s25, 256, %s73_s28, [#allocation8], %s830_s29, %s830_s29, %s831_s30  }
   0xe   :  { %818 = dma.done.wait [#allocation3], 128  }
   0xf   :  { %819 = vsyncadd [#allocation3], 4294967168 }
  0x10   :  { %820 = dma.done.wait [#allocation5], 1152  }
  0x11   :  { %821 = vsyncadd [#allocation5], 4294966144 }
  0x12   :  { %822 = dma.done.wait [#allocation8], 256  }
  0x13   :  { %823 = vsyncadd [#allocation8], 4294967040  ;;  %v678_v0 = vld [vmem:[#allocation4] sm:$0xff]  ;;  %v686_v1 = vld [vmem:[%s995_s2 + $0x38] sm:$0xff]  ;;  %vm113_vm0 = vcmask 130048  }
  0x14   :  { %v677_v2 = vld [vmem:[#allocation2] sm:$0xff]  ;;  %124 = vmatpush.bf16.msra.mxu0 %v678_v0  ;;  %200 = vmatpush.bf16.msra.mxu1 %v686_v1  ;;  %v685_v3 = vld [vmem:[%s995_s2 + $0x30] sm:$0xff]  ;;  %v684_v4 = vld [vmem:[%s995_s2 + $0x28] sm:$0xff] }
  0x15   :  { %v683_v5 = vld [vmem:[%s995_s2 + $0x20] sm:$0xff]  ;;  %v682_v6 = vld [vmem:[%s995_s2 + $0x18] sm:$0xff]  ;;  %v681_v7 = vld [vmem:[%s995_s2 + $0x10] sm:$0xff] }
  0x16   :  { %v680_v8 = vld [vmem:[%s995_s2 + $0x8] sm:$0xff]  ;;  %v679_v9 = vld [vmem:[%s995_s2] sm:$0xff]  ;;  %v100_v11 = vld [vmem:[#allocation7] sm:$0xff] }
  0x17   :  { %576 = vmatmul.msk.bf16.vlgmr.msra.gmra.mxu0 %vm113_vm0, %v677_v2  ;;  %v101_v12 = vld [vmem:[#allocation7 + $0x8] sm:$0xff]  ;;  %v711_v17 = vld [vmem:[%s996_s3] ss:$0 sm:$0xff]  ;;  %v694_v18 = vld [vmem:[#allocation6 + $0x38] sm:$0xff] }
  0x18   :  { %201 = vmatpush.bf16.msra.mxu1 %v685_v3  ;;  %371 = vmatpush.bf16.msra.mxu2 %v694_v18  ;;  %v693_v22 = vld [vmem:[#allocation6 + $0x30] sm:$0xff]  ;;  %v692_v24 = vld [vmem:[#allocation6 + $0x28] sm:$0xff]  ;;  %v691_v29 = vld [vmem:[#allocation6 + $0x20] sm:$0xff] }
  0x19   :  { %v690_v35 = vld [vmem:[#allocation6 + $0x18] sm:$0xff]  ;;  %v689_v41 = vld [vmem:[#allocation6 + $0x10] sm:$0xff]  ;;  %v688_v49 = vld [vmem:[#allocation6 + $0x8] sm:$0xff] }
  0x1a   :  { %v687_v56 = vld [vmem:[#allocation6] sm:$0xff] }
  0x1c   :  { %202 = vmatpush.bf16.msra.mxu1 %v684_v4  ;;  %372 = vmatpush.bf16.msra.mxu2 %v693_v22 }
  0x20   :  { %203 = vmatpush.bf16.msra.mxu1 %v683_v5  ;;  %373 = vmatpush.bf16.msra.mxu2 %v692_v24 }
  0x24   :  { %204 = vmatpush.bf16.msra.mxu1 %v682_v6  ;;  %374 = vmatpush.bf16.msra.mxu2 %v691_v29 }
  0x28   :  { %205 = vmatpush.bf16.msra.mxu1 %v681_v7  ;;  %375 = vmatpush.bf16.msra.mxu2 %v690_v35 }
  0x2c   :  { %206 = vmatpush.bf16.msra.mxu1 %v680_v8  ;;  %376 = vmatpush.bf16.msra.mxu2 %v689_v41 }
  0x30   :  { %207 = vmatpush.bf16.msra.mxu1 %v679_v9  ;;  %377 = vmatpush.bf16.msra.mxu2 %v688_v49  ;;  %v702_v49 = vld [vmem:[%s999_s6 + $0x38] sm:$0xff] }
  0x31   :  { %542 = vmatpush.bf16.msra.mxu3 %v702_v49 }
  0x34   :  { %378 = vmatpush.bf16.msra.mxu2 %v687_v56 }
  0x94   :  { %v126_v10 = vpop.f32.mrf.mxu0 }
  0x95   :  { %v127_v14 = vadd.f32 %v126_v10, %v100_v11 }
  0x9c   :  { %v128_v13 = vpop.f32.mrf.mxu0 }
  0x9d   :  { %v129_v15 = vadd.f32 %v128_v13, %v101_v12 }
  0x9f   :  { %v131_v16 = vpack.c.bf16 %v129_v15, %v127_v14 }
  0xa1   :  { %208 = vmatmul.bf16.vlgmr.msra.gmra.mxu1 %v131_v16 }
 0x11e   :  { %v209_v19 = vpop.f32.mrf.mxu1 }
 0x11f   :  { %v921_v20 = vadd.f32 %v711_v17, %v209_v19 }
 0x121   :  { %v924_v21 = vmul.f32 0.70710677, %v921_v20 }
 0x123   :  { %v218_v23 = vmul.f32 %v924_v21, %v924_v21 }
 0x125   :  { %v219_v25 = vmin.f32 %v218_v23, 16.0 }
 0x126   :  { %v211_v26 = vpop.f32.mrf.mxu1 }
 0x127   :  { %v220_v27 = vmul.f32 2.1237322e-06, %v219_v25  ;;  %v928_v28 = vadd.f32 %v711_v17, %v211_v26  ;;  %v231_v30 = vmul.f32 3.8918573e-05, %v219_v25 }
 0x129   :  { %v221_v31 = vadd.f32 0.00028619796, %v220_v27  ;;  %v931_v32 = vmul.f32 0.70710677, %v928_v28  ;;  %v232_v33 = vadd.f32 0.001143296, %v231_v30 }
 0x12b   :  { %v258_v34 = vmul.f32 %v931_v32, %v931_v32  ;;  %v222_v36 = vmul.f32 %v221_v31, %v219_v25  ;;  %v233_v37 = vmul.f32 %v232_v33, %v219_v25 }
 0x12d   :  { %v259_v38 = vmin.f32 %v258_v34, 16.0  ;;  %v234_v39 = vadd.f32 0.014752088, %v233_v37  ;;  %v223_v43 = vadd.f32 0.0036580483, %v222_v36 }
 0x12f   :  { %v260_v40 = vmul.f32 2.1237322e-06, %v259_v38  ;;  %v271_v42 = vmul.f32 3.8918573e-05, %v259_v38  ;;  %v235_v44 = vmul.f32 %v234_v39, %v219_v25  ;;  %v224_v51 = vmul.f32 %v223_v43, %v219_v25 }
 0x130   :  { %v215_v43 = vmul.f32 0.5, %v928_v28  ;;  %v701_v28 = vld [vmem:[%s999_s6 + $0x30] sm:$0xff] }
 0x131   :  { %v261_v45 = vadd.f32 0.00028619796, %v260_v40  ;;  %v272_v46 = vadd.f32 0.001143296, %v271_v42  ;;  %v236_v47 = vadd.f32 0.112945676, %v235_v44  ;;  %543 = vmatpush.bf16.msra.mxu3 %v701_v28 }
 0x132   :  { %v225_v58 = vadd.f32 0.05243302, %v224_v51  ;;  %v214_v42 = vmul.f32 0.5, %v921_v20 }
 0x133   :  { %v262_v48 = vmul.f32 %v261_v45, %v259_v38  ;;  %v273_v50 = vmul.f32 %v272_v46, %v259_v38  ;;  %v237_v52 = vmul.f32 %v236_v47, %v219_v25 }
 0x134   :  { %v226_v0 = vmul.f32 %v225_v58, %v219_v25  ;;  %v699_v58 = vld [vmem:[%s999_s6 + $0x20] sm:$0xff] }
 0x135   :  { %v263_v53 = vadd.f32 0.0036580483, %v262_v48  ;;  %v274_v54 = vadd.f32 0.014752088, %v273_v50  ;;  %v238_v55 = vadd.f32 0.4994258, %v237_v52 }
 0x136   :  { %v227_v4 = vadd.f32 0.18741608, %v226_v0  ;;  %v700_v52 = vld [vmem:[%s999_s6 + $0x28] sm:$0xff]  ;;  %v698_v0 = vld [vmem:[%s999_s6 + $0x18] sm:$0xff] }
 0x137   :  { %v275_v57 = vmul.f32 %v274_v54, %v259_v38  ;;  %v239_v59 = vmul.f32 %v238_v55, %v219_v25  ;;  %v264_v60 = vmul.f32 %v263_v53, %v259_v38  ;;  %544 = vmatpush.bf16.msra.mxu3 %v700_v52 }
 0x138   :  { %v228_v9 = vmul.f32 %v227_v4, %v219_v25 }
 0x139   :  { %v276_v61 = vadd.f32 0.112945676, %v275_v57  ;;  %v240_v62 = vadd.f32 1.0, %v239_v59  ;;  %v265_v1 = vadd.f32 0.05243302, %v264_v60 }
 0x13a   :  { %v229_v15 = vadd.f32 1.1283791, %v228_v9 }
 0x13b   :  { %v277_v63 = vmul.f32 %v276_v61, %v259_v38  ;;  %714 = vrcp.f32 %v240_v62  ;;  %v266_v5 = vmul.f32 %v265_v1, %v259_v38  ;;  %v252_v12 = vand.u32 2147483648, %v240_v62  ;;  %545 = vmatpush.bf16.msra.mxu3 %v699_v58 }
 0x13c   :  { %v250_v14 = vand.u32 2147483647, %v240_v62  ;;  %vm246_vm2 = vweird.f32 %v240_v62  ;;  %v230_v24 = vmul.f32 %v229_v15, %v924_v21  ;;  %v696_v15 = vld [vmem:[%s999_s6 + $0x8] sm:$0xff] }
 0x13d   :  { %v278_v2 = vadd.f32 0.4994258, %v277_v63  ;;  %v267_v10 = vadd.f32 0.18741608, %v266_v5  ;;  %v253_v19 = vor.u32 1.1754944e-38, %v252_v12 }
 0x13e   :  { %vm251_vm4 = vcmp.eq.f32.partialorder %v250_v14, 8.507059e+37 }
 0x13f   :  { %v279_v3 = vmul.f32 %v278_v2, %v259_v38  ;;  %v268_v17 = vmul.f32 %v267_v10, %v259_v38  ;;  %546 = vmatpush.bf16.msra.mxu3 %v698_v0 }
 0x141   :  { %v280_v6 = vadd.f32 1.0, %v279_v3  ;;  %v715_v7 = vpop.eup %714  ;;  %v269_v27 = vadd.f32 1.1283791, %v268_v17 }
 0x142   :  { %v242_v8 = vmul.f32 %v715_v7, %v240_v62  ;;  %vm247_vm1 = vweird.f32 %v715_v7 }
 0x143   :  { %716 = vrcp.f32 %v280_v6  ;;  %vm248_vm3 = vmor %vm246_vm2, %vm247_vm1  ;;  %v292_v29 = vand.u32 2147483648, %v280_v6  ;;  %v290_v33 = vand.u32 2147483647, %v280_v6  ;;  %vm286_vm6 = vweird.f32 %v280_v6 }
 0x144   :  { %v243_v11 = vsub.f32 1.0, %v242_v8  ;;  %v270_v36 = vmul.f32 %v269_v27, %v931_v32  ;;  %v712_v32 = vld [vmem:[%s998_s5] ss:$0 sm:$0xff]  ;;  %vm558_vm1 = vcmask 27648  }
 0x145   :  { %v293_v35 = vor.u32 1.1754944e-38, %v292_v29  ;;  %vm291_vm8 = vcmp.eq.f32.partialorder %v290_v33, 8.507059e+37 }
 0x146   :  { %v244_v13 = vmul.f32 %v715_v7, %v243_v11 }
 0x148   :  { %v245_v18 = vadd.f32 %v715_v7, %v244_v13 }
 0x149   :  { %v717_v16 = vpop.eup %716 }
 0x14a   :  { %v282_v22 = vmul.f32 %v717_v16, %v280_v6  ;;  %v249_v23 = vsel %vm248_vm3, %v715_v7, %v245_v18  ;;  %vm287_vm5 = vweird.f32 %v717_v16  ;;  %v697_v7 = vld [vmem:[%s999_s6 + $0x10] sm:$0xff] }
 0x14b   :  { %v254_v26 = vsel %vm251_vm4, %v253_v19, %v249_v23  ;;  %vm288_vm7 = vmor %vm286_vm6, %vm287_vm5  ;;  %547 = vmatpush.bf16.msra.mxu3 %v697_v7 }
 0x14c   :  { %v283_v25 = vsub.f32 1.0, %v282_v22  ;;  %v255_v30 = vmul.f32 %v254_v26, %v230_v24  ;;  %v695_v24 = vld [vmem:[%s999_s6] sm:$0xff] }
 0x14e   :  { %v284_v31 = vmul.f32 %v717_v16, %v283_v25  ;;  %v609_v37 = vclamps-f32 %v255_v30, 1.0 }
 0x14f   :  { %548 = vmatpush.bf16.msra.mxu3 %v696_v15 }
 0x150   :  { %v285_v34 = vadd.f32 %v717_v16, %v284_v31  ;;  %v298_v41 = vadd.f32 1.0, %v609_v37 }
 0x152   :  { %v289_v38 = vsel %vm288_vm7, %v717_v16, %v285_v34  ;;  %v300_v45 = vmul.f32 %v298_v41, %v214_v42 }
 0x153   :  { %v294_v39 = vsel %vm291_vm8, %v293_v35, %v289_v38  ;;  %549 = vmatpush.bf16.msra.mxu3 %v695_v24 }
 0x154   :  { %v295_v40 = vmul.f32 %v294_v39, %v270_v36 }
 0x156   :  { %v610_v21 = vclamps-f32 %v295_v40, 1.0 }
 0x158   :  { %v299_v44 = vadd.f32 1.0, %v610_v21 }
 0x15a   :  { %v301_v46 = vmul.f32 %v299_v44, %v215_v43 }
 0x15c   :  { %v302_v47 = vpack.c.bf16 %v301_v46, %v300_v45 }
 0x15e   :  { %379 = vmatmul.bf16.vlgmr.msra.gmra.mxu2 %v302_v47 }
 0x1e1   :  { %v380_v48 = vpop.f32.mrf.mxu2 }
 0x1e2   :  { %v945_v50 = vadd.f32 %v712_v32, %v380_v48 }
 0x1e4   :  { %v948_v20 = vmul.f32 0.70710677, %v945_v50 }
 0x1e6   :  { %v389_v51 = vmul.f32 %v948_v20, %v948_v20 }
 0x1e8   :  { %v390_v53 = vmin.f32 %v389_v51, 16.0 }
 0x1e9   :  { %v382_v54 = vpop.f32.mrf.mxu2 }
 0x1ea   :  { %v391_v55 = vmul.f32 2.1237322e-06, %v390_v53  ;;  %v958_v56 = vadd.f32 %v712_v32, %v382_v54  ;;  %v402_v57 = vmul.f32 3.8918573e-05, %v390_v53 }
 0x1ec   :  { %v392_v59 = vadd.f32 0.00028619796, %v391_v55  ;;  %v964_v60 = vmul.f32 0.70710677, %v958_v56  ;;  %v403_v61 = vadd.f32 0.001143296, %v402_v57 }
 0x1ed   :  { %v386_v7 = vmul.f32 0.5, %v958_v56 }
 0x1ee   :  { %v429_v62 = vmul.f32 %v964_v60, %v964_v60  ;;  %v393_v63 = vmul.f32 %v392_v59, %v390_v53  ;;  %v404_v1 = vmul.f32 %v403_v61, %v390_v53 }
 0x1f0   :  { %v430_v2 = vmin.f32 %v429_v62, 16.0  ;;  %v405_v3 = vadd.f32 0.014752088, %v404_v1  ;;  %v394_v6 = vadd.f32 0.0036580483, %v393_v63 }
 0x1f2   :  { %v431_v4 = vmul.f32 2.1237322e-06, %v430_v2  ;;  %v442_v5 = vmul.f32 3.8918573e-05, %v430_v2  ;;  %v406_v8 = vmul.f32 %v405_v3, %v390_v53  ;;  %v395_v14 = vmul.f32 %v394_v6, %v390_v53 }
 0x1f3   :  { %v385_v6 = vmul.f32 0.5, %v945_v50 }
 0x1f4   :  { %v432_v9 = vadd.f32 0.00028619796, %v431_v4  ;;  %v443_v10 = vadd.f32 0.001143296, %v442_v5  ;;  %v407_v11 = vadd.f32 0.112945676, %v406_v8 }
 0x1f5   :  { %v396_v23 = vadd.f32 0.05243302, %v395_v14 }
 0x1f6   :  { %v433_v12 = vmul.f32 %v432_v9, %v430_v2  ;;  %v444_v13 = vmul.f32 %v443_v10, %v430_v2  ;;  %v408_v16 = vmul.f32 %v407_v11, %v390_v53 }
 0x1f7   :  { %v397_v31 = vmul.f32 %v396_v23, %v390_v53 }
 0x1f8   :  { %v434_v17 = vadd.f32 0.0036580483, %v433_v12  ;;  %v445_v18 = vadd.f32 0.014752088, %v444_v13  ;;  %v409_v19 = vadd.f32 0.4994258, %v408_v16 }
 0x1f9   :  { %v398_v36 = vadd.f32 0.18741608, %v397_v31 }
 0x1fa   :  { %v446_v22 = vmul.f32 %v445_v18, %v430_v2  ;;  %v410_v26 = vmul.f32 %v409_v19, %v390_v53  ;;  %v435_v25 = vmul.f32 %v434_v17, %v430_v2 }
 0x1fb   :  { %v399_v21 = vmul.f32 %v398_v36, %v390_v53 }
 0x1fc   :  { %v447_v27 = vadd.f32 0.112945676, %v446_v22  ;;  %v411_v29 = vadd.f32 1.0, %v410_v26  ;;  %v436_v33 = vadd.f32 0.05243302, %v435_v25 }
 0x1fd   :  { %v400_v46 = vadd.f32 1.1283791, %v399_v21 }
 0x1fe   :  { %v448_v30 = vmul.f32 %v447_v27, %v430_v2  ;;  %718 = vrcp.f32 %v411_v29  ;;  %v437_v37 = vmul.f32 %v436_v33, %v430_v2  ;;  %v423_v43 = vand.u32 2147483648, %v411_v29 }
 0x1ff   :  { %v421_v45 = vand.u32 2147483647, %v411_v29  ;;  %vm417_vm10 = vweird.f32 %v411_v29  ;;  %v401_v52 = vmul.f32 %v400_v46, %v948_v20 }
 0x200   :  { %v449_v34 = vadd.f32 0.4994258, %v448_v30  ;;  %v438_v41 = vadd.f32 0.18741608, %v437_v37  ;;  %v424_v49 = vor.u32 1.1754944e-38, %v423_v43 }
 0x201   :  { %vm422_vm12 = vcmp.eq.f32.partialorder %v421_v45, 8.507059e+37 }
 0x202   :  { %v450_v35 = vmul.f32 %v449_v34, %v430_v2  ;;  %v439_v32 = vmul.f32 %v438_v41, %v430_v2 }
 0x204   :  { %v451_v38 = vadd.f32 1.0, %v450_v35  ;;  %v719_v39 = vpop.eup %718  ;;  %v440_v55 = vadd.f32 1.1283791, %v439_v32 }
 0x205   :  { %v413_v40 = vmul.f32 %v719_v39, %v411_v29  ;;  %vm418_vm9 = vweird.f32 %v719_v39 }
 0x206   :  { %720 = vrcp.f32 %v451_v38  ;;  %vm419_vm11 = vmor %vm417_vm10, %vm418_vm9  ;;  %v463_v57 = vand.u32 2147483648, %v451_v38  ;;  %v461_v61 = vand.u32 2147483647, %v451_v38  ;;  %vm457_vm14 = vweird.f32 %v451_v38 }
 0x207   :  { %v414_v42 = vsub.f32 1.0, %v413_v40  ;;  %v441_v0 = vmul.f32 %v440_v55, %v964_v60  ;;  %v713_v60 = vld [vmem:[%s1000_s7] ss:$0 sm:$0xff] }
 0x208   :  { %v464_v63 = vor.u32 1.1754944e-38, %v463_v57  ;;  %vm462_vm0 = vcmp.eq.f32.partialorder %v461_v61, 8.507059e+37 }
 0x209   :  { %v415_v44 = vmul.f32 %v719_v39, %v414_v42 }
 0x20b   :  { %v416_v48 = vadd.f32 %v719_v39, %v415_v44 }
 0x20c   :  { %v721_v47 = vpop.eup %720 }
 0x20d   :  { %v453_v28 = vmul.f32 %v721_v47, %v451_v38  ;;  %v420_v51 = vsel %vm419_vm11, %v719_v39, %v416_v48  ;;  %vm458_vm13 = vweird.f32 %v721_v47 }
 0x20e   :  { %v425_v54 = vsel %vm422_vm12, %v424_v49, %v420_v51  ;;  %vm459_vm15 = vmor %vm457_vm14, %vm458_vm13 }
 0x20f   :  { %v454_v53 = vsub.f32 1.0, %v453_v28  ;;  %v426_v58 = vmul.f32 %v425_v54, %v401_v52 }
 0x211   :  { %v455_v59 = vmul.f32 %v721_v47, %v454_v53  ;;  %v643_v1 = vclamps-f32 %v426_v58, 1.0 }
 0x213   :  { %v456_v62 = vadd.f32 %v721_v47, %v455_v59  ;;  %v469_v5 = vadd.f32 1.0, %v643_v1 }
 0x215   :  { %v460_v2 = vsel %vm459_vm15, %v721_v47, %v456_v62  ;;  %v471_v9 = vmul.f32 %v469_v5, %v385_v6 }
 0x216   :  { %v465_v3 = vsel %vm462_vm0, %v464_v63, %v460_v2 }
 0x217   :  { %v466_v4 = vmul.f32 %v465_v3, %v441_v0 }
 0x219   :  { %v644_v20 = vclamps-f32 %v466_v4, 1.0 }
 0x21b   :  { %v470_v8 = vadd.f32 1.0, %v644_v20 }
 0x21d   :  { %v472_v10 = vmul.f32 %v470_v8, %v386_v7 }
 0x21f   :  { %v473_v11 = vpack.c.bf16 %v472_v10, %v471_v9 }
 0x221   :  { %550 = vmatmul.bf16.vlgmr.msra.gmra.mxu3 %v473_v11 }
 0x2a4   :  { %v551_v12 = vpop.f32.mrf.mxu3 }
 0x2a5   :  { %v552_v13 = vadd.f32 %v713_v60, %v551_v12 }
 0x2a7   :  { %v556_v14 = vpack.c.bf16 %v552_v13, %v552_v13 }
 0x2a9   :  { %559 = vst.msk [vmem:[%s1002_s9] sm:$0xf] %vm558_vm1, %v556_v14 }
 0x2ac   :  { %v553_v50 = vpop.f32.mrf.mxu3 }
 0x2ad   :  { %v554_v15 = vadd.f32 %v713_v60, %v553_v50 }
 0x2af   :  { %v557_v56 = vpack.c.bf16 %v554_v15, %v554_v15 }
 0x2b1   :  { %560 = vst.msk [vmem:[%s1002_s9 + $0x4] sm:$0xf] %vm558_vm1, %v557_v56 }
 0x2b2   :  { %565 = vsyncpa [#allocation3], 1 }
 0x2b3   :  { %566 = vsyncpa [#allocation5], 1 }
 0x2b4   :  { %567 = vsyncpa [#allocation8], 1 }

</bundles_post_ra>
